<compile_context>
chip_gen: v7x
topology: tpu7x:2x2x1
jax: 0.10.0
libtpu: 0.0.40
codegen_flags: <defaults>
</compile_context>

<pallas_src>
import functools
import math

import jax
import jax.numpy as jnp
from jax import lax
from jax.experimental import pallas as pl
from jax.experimental.pallas import tpu as pltpu

GAMMA = 0.1                      # PC inference step size (not in the source)


def _detect_vmem_limit():
    """Scoped-VMEM budget derived from the physical VMEM of the local TPU."""
    try:
        cap = int(pltpu.get_tpu_info().vmem_capacity_bytes)
    except Exception:
        cap = 64 * 1024 * 1024   # conservative default (v7x per-TC)
    return min(cap * 3 // 4, 100 * 1024 * 1024)


VMEM_LIMIT = _detect_vmem_limit()
_WS_BUDGET = int(VMEM_LIMIT * 0.8)   # headroom for Mosaic-internal scratch


# --------------------------------------------------------------------------
# Pallas kernels
# --------------------------------------------------------------------------
def _gelu_and_grad(pre):
    # TODO(synk): tanh-approx GELU; PyTorch nn.GELU default is the exact erf form.
    c = 0.7978845608028654  # sqrt(2/pi)
    a = 0.044715
    u = c * (pre + a * pre * pre * pre)
    t = jnp.tanh(u)
    g = 0.5 * pre * (1.0 + t)
    dg = 0.5 * (1.0 + t) + 0.5 * pre * (1.0 - t * t) * c * (1.0 + 3.0 * a * pre * pre)
    return g, dg


def _pc_update_kernel(*refs, act, apply_ln, onehot, gamma):
    """Tiled PC update for a linear (or fc1+GELU) layer.

    grid = (row_tiles [parallel], dout_tiles [arbitrary/reduction]).
    pred = act(x W^T + b) on the current Dout tile; err = (LN?)(target) - pred;
    out += err @ W (out block is resident over the Dout axis and doubles as
    the f32 accumulator); x <- x + gamma * out at the last Dout tile.
    With onehot=True the target ref holds raw int32 ids and the one-hot tile
    is synthesized in-kernel (no (N, V) f32 target in HBM).
    """
    if apply_ln:
        x_ref, w_ref, b_ref, tgt_ref, ln_g_ref, ln_b_ref, out_ref = refs
    else:
        x_ref, w_ref, b_ref, tgt_ref, out_ref = refs
        ln_g_ref = ln_b_ref = None

    j = pl.program_id(1)
    nj = pl.num_programs(1)

    @pl.when(j == 0)
    def _init():
        out_ref[...] = jnp.zeros_like(out_ref)

    x = x_ref[...]                                   # (TM, Din) f32 latent
    xb = x.astype(jnp.bfloat16)
    w = w_ref[...]                                   # (TN, Din) bf16
    # pred = x @ W^T  (contract trailing dims; no transpose materialized)
    pred = lax.dot_general(xb, w, (((1,), (1,)), ((), ())),
                           preferred_element_type=jnp.float32) + b_ref[...]

    if onehot:
        tm, tn = pred.shape
        col = lax.broadcasted_iota(jnp.int32, (tm, tn), 1) + j * tn
        tgt = (tgt_ref[...] == col).astype(jnp.float32)      # in-kernel one-hot
    else:
        tgt = tgt_ref[...]                                    # (TM, TN) f32
        if apply_ln:
            # Fused layer norm of the top-down target (full feature width tile).
            mu = jnp.mean(tgt, axis=-1, keepdims=True)
            var = jnp.mean(jnp.square(tgt - mu), axis=-1, keepdims=True)
            tgt = (tgt - mu) * lax.rsqrt(var + 1e-5) * ln_g_ref[...] + ln_b_ref[...]

    if act == "gelu":
        g, dg = _gelu_and_grad(pred)
        err = (tgt - g) * dg
    else:
        err = tgt - pred

    # out += err @ W   (contract err's Dout with W's Dout; no transpose)
    # NOTE: err is cast to bf16 for the MXU; f32 accumulation.
    out_ref[...] += lax.dot_general(err.astype(jnp.bfloat16), w,
                                    (((1,), (0,)), ((), ())),
                                    preferred_element_type=jnp.float32)

    @pl.when(j == nj - 1)
    def _finalize():
        out_ref[...] = x + gamma * out_ref[...]


def _linear_predict_kernel(x_ref, w_ref, b_ref, out_ref):
    """out = x W^T + b   (final logits), tiled over (rows, vocab)."""
    out_ref[...] = lax.dot_general(
        x_ref[...].astype(jnp.bfloat16), w_ref[...],
        (((1,), (1,)), ((), ())),
        preferred_element_type=jnp.float32) + b_ref[...]


def _pc_attn_update_kernel(x_ref, wq_ref, wk_ref, wv_ref, bq_ref, bk_ref, bv_ref,
                           tgt_ref, out_ref, *, gamma):
    """Multi-head causal self-attention PC update; grid = (batch, head).

    Per grid step (one head of one batch element):
      pred_h = softmax(q_h k_h^T / sqrt(dh)) v_h ;  err_h = target_h - pred_h
      out    += (A_h^T err_h) Wv_h      (out block resident over the head axis)
    Final head:  x <- x + gamma * out.
    Weights arrive pre-split per head as (H, dh, D); the target arrives as
    (B, H, S, dh); no in-kernel lane slicing, reshape, transpose or concatenate.
    # TODO(synk): gradient path through softmax / Q,K projections is omitted
    #             (V-path only), since the reference PC update rule is unavailable.
    """
    h = pl.program_id(1)
    nh = pl.num_programs(1)

    @pl.when(h == 0)
    def _init():
        out_ref[...] = jnp.zeros_like(out_ref)

    x = x_ref[0]                         # (S, D) f32
    S, _ = x.shape
    dh = wq_ref.shape[1]
    scale = 1.0 / math.sqrt(dh)
    xb = x.astype(jnp.bfloat16)

    wq = wq_ref[0]                       # (dh, D) bf16
    wk = wk_ref[0]
    wv = wv_ref[0]

    # per-head projections: x @ W_h^T  -> (S, dh), f32 accumulate
    qh = lax.dot_general(xb, wq, (((1,), (1,)), ((), ())),
                         preferred_element_type=jnp.float32) + bq_ref[0]
    kh = lax.dot_general(xb, wk, (((1,), (1,)), ((), ())),
                         preferred_element_type=jnp.float32) + bk_ref[0]
    vh = lax.dot_general(xb, wv, (((1,), (1,)), ((), ())),
                         preferred_element_type=jnp.float32) + bv_ref[0]

    # scores = q k^T / sqrt(dh)   (contract trailing dh of both; no .T)
    s = lax.dot_general(qh.astype(jnp.bfloat16), kh.astype(jnp.bfloat16),
                        (((1,), (1,)), ((), ())),
                        preferred_element_type=jnp.float32) * scale
    row = lax.broadcasted_iota(jnp.int32, (S, S), 0)
    col = lax.broadcasted_iota(jnp.int32, (S, S), 1)
    s = jnp.where(row >= col, s, -1e30)
    s = s - jnp.max(s, axis=-1, keepdims=True)
    e = jnp.exp(s)
    a = e * pl.reciprocal(jnp.sum(e, axis=-1, keepdims=True), approx=True)
    ab = a.astype(jnp.bfloat16)

    pred_h = lax.dot_general(ab, vh.astype(jnp.bfloat16),
                             (((1,), (0,)), ((), ())),
                             preferred_element_type=jnp.float32)      # (S, dh)
    err_h = (tgt_ref[0, 0] - pred_h).astype(jnp.bfloat16)             # (S, dh)
    # A^T err without materializing A^T (contract the query axis of both)
    grad_h = lax.dot_general(ab, err_h, (((0,), (0,)), ((), ())),
                             preferred_element_type=jnp.float32)      # (S, dh)
    # out += grad_h @ Wv_h
    out_ref[0] += lax.dot_general(grad_h.astype(jnp.bfloat16), wv,
                                  (((1,), (0,)), ((), ())),
                                  preferred_element_type=jnp.float32)  # (S, D)

    @pl.when(h == nh - 1)
    def _finalize():
        out_ref[0] = x + gamma * out_ref[0]


# --------------------------------------------------------------------------
# Kernel wrappers
# --------------------------------------------------------------------------
def _divisor_tile(n, candidates):
    for c in candidates:
        if c <= n and n % c == 0:
            return c
    return n


def _choose_row_tile(N, Din, TN, budget):
    """Largest row tile whose double-buffered working set fits the budget."""
    for tm in (512, 256, 128, 64, 32, 16, 8):
        if tm > N or N % tm:
            continue
        est = 2 * (tm * Din * 4      # x       (f32)
                   + TN * Din * 2    # weight  (bf16)
                   + tm * TN * 4     # target  (f32, conservative for onehot)
                   + tm * Din * 4)   # out/acc (f32)
        if est <= budget:
            return tm
    return _divisor_tile(N, (8, 16, 32, 64))


def pc_linear_update(x, w, b, target, *, gamma=GAMMA, act="linear",
                     ln_params=None, onehot_ids=False):
    """x: (N, Din) f32, w: (Dout, Din) bf16, b: (Dout,) f32.

    target: (N, Dout) f32 dense top-down target, or (N, 1) int32 class ids
    when onehot_ids=True (one-hot built in-kernel).
    """
    N, Din = x.shape
    Dout = w.shape[0]
    apply_ln = ln_params is not None

    TN = Dout if apply_ln else _divisor_tile(Dout, (512, 256, 128))
    TM = _choose_row_tile(N, Din, TN, _WS_BUDGET)
    grid = (N // TM, Dout // TN)

    x_spec = pl.BlockSpec((TM, Din), lambda i, j: (i, 0))
    w_spec = pl.BlockSpec((TN, Din), lambda i, j: (j, 0))
    b_spec = pl.BlockSpec((1, TN), lambda i, j: (0, j))
    if onehot_ids:
        t_spec = pl.BlockSpec((TM, 1), lambda i, j: (i, 0))
    else:
        t_spec = pl.BlockSpec((TM, TN), lambda i, j: (i, j))
    out_spec = pl.BlockSpec((TM, Din), lambda i, j: (i, 0))   # resident over j

    in_specs = [x_spec, w_spec, b_spec, t_spec]
    args = [x, w, b.reshape(1, -1), target]
    if apply_ln:
        ln_g, ln_b = ln_params
        ln_spec = pl.BlockSpec((1, TN), lambda i, j: (0, j))
        in_specs += [ln_spec, ln_spec]
        args += [ln_g.reshape(1, -1), ln_b.reshape(1, -1)]

    kernel = functools.partial(_pc_update_kernel, act=act, apply_ln=apply_ln,
                               onehot=onehot_ids, gamma=gamma)
    return pl.pallas_call(
        kernel,
        out_shape=jax.ShapeDtypeStruct((N, Din), x.dtype),
        grid_spec=pltpu.PrefetchScalarGridSpec(
            num_scalar_prefetch=0,
            grid=grid,
            in_specs=in_specs,
            out_specs=out_spec,
        ),
        compiler_params=pltpu.CompilerParams(
            dimension_semantics=("parallel", "arbitrary"),
            vmem_limit_bytes=VMEM_LIMIT),
    )(*args)


def linear_predict(x, w, b):
    """logits = x W^T + b ; x: (N, Din) f32, w: (V, Din) bf16, b: (V,) f32."""
    N, Din = x.shape
    V = w.shape[0]
    TV = _divisor_tile(V, (512, 256, 128))
    TM = _choose_row_tile(N, Din, TV, _WS_BUDGET)
    grid = (N // TM, V // TV)
    return pl.pallas_call(
        _linear_predict_kernel,
        out_shape=jax.ShapeDtypeStruct((N, V), jnp.float32),
        grid_spec=pltpu.PrefetchScalarGridSpec(
            num_scalar_prefetch=0,
            grid=grid,
            in_specs=[pl.BlockSpec((TM, Din), lambda i, v: (i, 0)),
                      pl.BlockSpec((TV, Din), lambda i, v: (v, 0)),
                      pl.BlockSpec((1, TV), lambda i, v: (0, v))],
            out_specs=pl.BlockSpec((TM, TV), lambda i, v: (i, v)),
        ),
        compiler_params=pltpu.CompilerParams(
            dimension_semantics=("parallel", "parallel"),
            vmem_limit_bytes=VMEM_LIMIT),
    )(x, w, b.reshape(1, -1))


def pc_attn_update(x, wq, wk, wv, bq, bk, bv, target, n_heads, gamma=GAMMA):
    """x, target: (B, S, D) f32; wq/wk/wv: (D, D) bf16; bq/bk/bv: (D,) f32."""
    B, S, D = x.shape
    dh = D // n_heads
    # Wrapper-side layout plumbing (pure XLA): per-head weight slabs and a
    # heads-major target so the kernel never lane-slices sub-128 chunks.
    # TODO(synk): storing the attn-output latent head-major across steps (or
    #             in-kernel lane slicing when dh is a multiple of 128) would
    #             remove this per-call HBM transpose of the target.
    wq3 = wq.reshape(n_heads, dh, D)
    wk3 = wk.reshape(n_heads, dh, D)
    wv3 = wv.reshape(n_heads, dh, D)
    bq3 = bq.reshape(n_heads, 1, dh)
    bk3 = bk.reshape(n_heads, 1, dh)
    bv3 = bv.reshape(n_heads, 1, dh)
    tgt_h = target.reshape(B, S, n_heads, dh).transpose(0, 2, 1, 3)   # (B,H,S,dh)

    x_spec = pl.BlockSpec((1, S, D), lambda b, h: (b, 0, 0))          # resident over h
    w_spec = pl.BlockSpec((1, dh, D), lambda b, h: (h, 0, 0))
    b_spec = pl.BlockSpec((1, 1, dh), lambda b, h: (h, 0, 0))
    t_spec = pl.BlockSpec((1, 1, S, dh), lambda b, h: (b, h, 0, 0))

    return pl.pallas_call(
        functools.partial(_pc_attn_update_kernel, gamma=gamma),
        out_shape=jax.ShapeDtypeStruct((B, S, D), x.dtype),
        grid_spec=pltpu.PrefetchScalarGridSpec(
            num_scalar_prefetch=0,
            grid=(B, n_heads),
            in_specs=[x_spec, w_spec, w_spec, w_spec,
                      b_spec, b_spec, b_spec, t_spec],
            out_specs=x_spec,
        ),
        compiler_params=pltpu.CompilerParams(
            dimension_semantics=("parallel", "arbitrary"),
            vmem_limit_bytes=VMEM_LIMIT),
    )(x, wq3, wk3, wv3, bq3, bk3, bv3, tgt_h)


# --------------------------------------------------------------------------
# Parameters & orchestration (plain-JAX glue)
# --------------------------------------------------------------------------
def init_params(key, cfg):
    V, D, S, nb = cfg["vocab_size"], cfg["n_embd"], cfg["max_seq"], cfg["n_blocks"]
    Dff = 4 * D
    keys = iter(jax.random.split(key, 64))
    std = 0.02

    def w(shape, dtype=jnp.bfloat16):      # weights stored bf16 (MXU operands)
        return (std * jax.random.normal(next(keys), shape)).astype(dtype)

    params = {
        "wte": w((V, D), jnp.float32),
        "wpe": w((S, D), jnp.float32),
        "w_out": w((V, D)),
        "b_out": jnp.zeros((V,), jnp.float32),
        "blocks": [],
    }
    for _ in range(nb):
        params["blocks"].append({
            "wq": w((D, D)), "bq": jnp.zeros((D,), jnp.float32),
            "wk": w((D, D)), "bk": jnp.zeros((D,), jnp.float32),
            "wv": w((D, D)), "bv": jnp.zeros((D,), jnp.float32),
            "wo": w((D, D)), "bo": jnp.zeros((D,), jnp.float32),
            "w1": w((Dff, D)), "b1": jnp.zeros((Dff,), jnp.float32),
            "w2": w((D, Dff)), "b2": jnp.zeros((D,), jnp.float32),
            "ln1_g": jnp.ones((D,), jnp.float32), "ln1_b": jnp.zeros((D,), jnp.float32),
            "ln2_g": jnp.ones((D,), jnp.float32), "ln2_b": jnp.zeros((D,), jnp.float32),
        })
    return params


def pc_transformer_forward(params, target_ids, input_ids, cfg):
    B, S = input_ids.shape
    V, D, H = cfg["vocab_size"], cfg["n_embd"], cfg["n_heads"]
    Dff, nb, T = 4 * cfg["n_embd"], cfg["n_blocks"], cfg["T"]

    # One-hot target is built in-kernel from the raw ids (no (B*S, V) f32
    # target tensor is ever materialized or streamed from HBM).
    ids_flat = target_ids.reshape(B * S, 1).astype(jnp.int32)

    # Embedding PC layer: in eval mode the embedding forward only accumulates
    # energy and does not influence the returned logits.
    # TODO(synk): embedding-latent energy bookkeeping not implemented.

    xs = {"out": jnp.zeros((B, S, D), jnp.float32)}
    for i in range(nb):
        xs[f"qkv_{i}"] = jnp.zeros((B, S, D), jnp.float32)
        xs[f"attn_out_{i}"] = jnp.zeros((B, S, D), jnp.float32)
        xs[f"mlp1_{i}"] = jnp.zeros((B, S, D), jnp.float32)
        xs[f"mlp2_{i}"] = jnp.zeros((B, S, Dff), jnp.float32)

    def flat(a):
        return a.reshape(B * S, a.shape[-1])

    def unflat(a):
        return a.reshape(B, S, a.shape[-1])

    # T steps of top-down predictive-coding inference (Jacobi / synchronous).
    # TODO(synk): keeping weights resident across the T steps (one fused kernel
    #             with T as an in-kernel loop) requires a whole-network kernel
    #             because of cross-layer latent dependencies each step.
    for _t in range(T):
        old = dict(xs)

        # output PC layer: target = one-hot labels (synthesized in-kernel)
        xs["out"] = unflat(pc_linear_update(
            flat(old["out"]), params["w_out"], params["b_out"],
            ids_flat, onehot_ids=True))

        for i in range(nb - 1, -1, -1):
            blk = params["blocks"][i]
            next_target = old[f"qkv_{i + 1}"] if i < nb - 1 else old["out"]

            # mlp2 (fc2): target = LN2(next latent), LN fused in-kernel
            xs[f"mlp2_{i}"] = unflat(pc_linear_update(
                flat(old[f"mlp2_{i}"]), blk["w2"], blk["b2"], flat(next_target),
                ln_params=(blk["ln2_g"], blk["ln2_b"])))

            # mlp1 (fc1 + GELU): target = mlp2 latent (old snapshot)
            xs[f"mlp1_{i}"] = unflat(pc_linear_update(
                flat(old[f"mlp1_{i}"]), blk["w1"], blk["b1"],
                flat(old[f"mlp2_{i}"]), act="gelu"))

            # attention output proj: target = LN1(mlp1 latent), LN fused
            xs[f"attn_out_{i}"] = unflat(pc_linear_update(
                flat(old[f"attn_out_{i}"]), blk["wo"], blk["bo"],
                flat(old[f"mlp1_{i}"]),
                ln_params=(blk["ln1_g"], blk["ln1_b"])))

            # attention qkv PC layer: target = attn-output latent (old snapshot)
            xs[f"qkv_{i}"] = pc_attn_update(
                old[f"qkv_{i}"], blk["wq"], blk["wk"], blk["wv"],
                blk["bq"], blk["bk"], blk["bv"], old[f"attn_out_{i}"], H)

        # embedding.pc_layer.forward: eval mode -> no state change affecting logits.

    # logits = output_x @ W_out^T + b_out
    logits = linear_predict(flat(xs["out"]), params["w_out"], params["b_out"])
    return logits.reshape(B, S, V)


# --------------------------------------------------------------------------
if __name__ == "__main__":
    cfg = dict(n_blocks=2, vocab_size=64, n_embd=32, n_heads=4, T=3, max_seq=8)
    B, S = 2, 8

    key = jax.random.PRNGKey(0)
    k_in, k_tgt = jax.random.split(key)
    input_ids = jax.random.randint(k_in, (B, S), 0, cfg["vocab_size"])
    target_ids = jax.random.randint(k_tgt, (B, S), 0, cfg["vocab_size"])

    params = init_params(jax.random.PRNGKey(42), cfg)

    fwd = jax.jit(functools.partial(pc_transformer_forward, cfg=cfg))
    logits = jax.block_until_ready(fwd(params, target_ids, input_ids))

    assert logits.shape == (B, S, cfg["vocab_size"])
    assert bool(jnp.all(jnp.isfinite(logits)))
    print("KERNEL_OK")
</pallas_src>

<mosaic_0001>
module attributes {stable_mosaic.version = 11 : i64} {
  func.func @_pc_update_kernel(%arg0: i32, %arg1: i32, %arg2: memref<16x32xf32, #tpu.memory_space<vmem>>, %arg3: memref<64x32xbf16, #tpu.memory_space<vmem>>, %arg4: memref<1x64xf32, #tpu.memory_space<vmem>>, %arg5: memref<16x1xi32, #tpu.memory_space<vmem>>, %arg6: memref<16x32xf32, #tpu.memory_space<vmem>>) attributes {dimension_semantics = [#tpu.dimension_semantics<parallel>, #tpu.dimension_semantics<arbitrary>], iteration_bounds = array<i64: 1, 1>, scalar_prefetch = 0 : i64, scratch_operands = 0 : i64, tpu.core_type = #tpu.core_type<tc>, window_params = [{transform_indices = @transform_0, window_bounds = array<i64: 16, 32>}, {transform_indices = @transform_1, window_bounds = array<i64: 64, 32>}, {transform_indices = @transform_2, window_bounds = array<i64: 1, 64>}, {transform_indices = @transform_3, window_bounds = array<i64: 16, 1>}, {transform_indices = @transform_4, window_bounds = array<i64: 16, 32>}]} {
    %c0_i32 = arith.constant 0 : i32
    %0 = arith.cmpi eq, %arg1, %c0_i32 : i32
    %1 = arith.extui %0 : i1 to i32
    %c0_i32_0 = arith.constant 0 : i32
    %2 = arith.cmpi ne, %1, %c0_i32_0 : i32
    scf.if %2 {
      %cst_15 = arith.constant 0.000000e+00 : f32
      %28 = vector.broadcast %cst_15 : f32 to vector<16x32xf32>
      %c0_16 = arith.constant 0 : index
      %c0_17 = arith.constant 0 : index
      %29 = vector.load %arg6[%c0_16, %c0_17] : memref<16x32xf32, #tpu.memory_space<vmem>>, vector<16x32xf32>
      tpu.vector_store %arg6[%c0_16, %c0_17], %28 {strides = array<i32>} : memref<16x32xf32, #tpu.memory_space<vmem>>, vector<16x32xf32>,
    } else {
    }
    %c0 = arith.constant 0 : index
    %c0_1 = arith.constant 0 : index
    %3 = vector.load %arg2[%c0, %c0_1] : memref<16x32xf32, #tpu.memory_space<vmem>>, vector<16x32xf32>
    %4 = arith.truncf %3 : vector<16x32xf32> to vector<16x32xbf16>
    %c0_2 = arith.constant 0 : index
    %c0_3 = arith.constant 0 : index
    %5 = vector.load %arg3[%c0_2, %c0_3] : memref<64x32xbf16, #tpu.memory_space<vmem>>, vector<64x32xbf16>
    %cst = arith.constant dense<0.000000e+00> : vector<16x64xf32>
    %6 = tpu.matmul %4, %5, %cst {dimension_numbers = #tpu.dot_dimension_numbers<[1], [1], [0], [0], [0, 0, 1, 0], [], []>} : vector<16x32xbf16>, vector<64x32xbf16>, vector<16x64xf32> -> vector<16x64xf32>
    %c0_4 = arith.constant 0 : index
    %c0_5 = arith.constant 0 : index
    %7 = vector.load %arg4[%c0_4, %c0_5] : memref<1x64xf32, #tpu.memory_space<vmem>>, vector<1x64xf32>
    %8 = vector.broadcast %7 : vector<1x64xf32> to vector<16x64xf32>
    %9 = arith.addf %6, %8 : vector<16x64xf32>
    %10 = tpu.iota {dimensions = array<i32: 1>} : vector<16x64xi32>
    %c64_i32 = arith.constant 64 : i32
    %11 = arith.muli %arg1, %c64_i32 : i32
    %12 = vector.broadcast %11 : i32 to vector<16x64xi32>
    %13 = arith.addi %10, %12 : vector<16x64xi32>
    %c0_6 = arith.constant 0 : index
    %c0_7 = arith.constant 0 : index
    %14 = vector.load %arg5[%c0_6, %c0_7] : memref<16x1xi32, #tpu.memory_space<vmem>>, vector<16x1xi32>
    %15 = vector.broadcast %14 : vector<16x1xi32> to vector<16x64xi32>
    %16 = arith.cmpi eq, %15, %13 : vector<16x64xi32>
    %17 = arith.extui %16 : vector<16x64xi1> to vector<16x64xi32>
    %18 = arith.sitofp %17 : vector<16x64xi32> to vector<16x64xf32>
    %19 = arith.subf %18, %9 : vector<16x64xf32>
    %c0_8 = arith.constant 0 : index
    %c0_9 = arith.constant 0 : index
    %20 = vector.load %arg6[%c0_8, %c0_9] : memref<16x32xf32, #tpu.memory_space<vmem>>, vector<16x32xf32>
    %21 = arith.truncf %19 : vector<16x64xf32> to vector<16x64xbf16>
    %cst_10 = arith.constant dense<0.000000e+00> : vector<16x32xf32>
    %22 = tpu.matmul %21, %5, %cst_10 {dimension_numbers = #tpu.dot_dimension_numbers<[1], [0], [0], [1], [0, 0, 1, 1], [], []>} : vector<16x64xbf16>, vector<64x32xbf16>, vector<16x32xf32> -> vector<16x32xf32>
    %23 = arith.addf %20, %22 : vector<16x32xf32>
    %c0_11 = arith.constant 0 : index
    %c0_12 = arith.constant 0 : index
    %24 = vector.load %arg6[%c0_11, %c0_12] : memref<16x32xf32, #tpu.memory_space<vmem>>, vector<16x32xf32>
    tpu.vector_store %arg6[%c0_11, %c0_12], %23 {strides = array<i32>} : memref<16x32xf32, #tpu.memory_space<vmem>>, vector<16x32xf32>,
    %c0_i32_13 = arith.constant 0 : i32
    %25 = arith.cmpi eq, %arg1, %c0_i32_13 : i32
    %26 = arith.extui %25 : i1 to i32
    %c0_i32_14 = arith.constant 0 : i32
    %27 = arith.cmpi ne, %26, %c0_i32_14 : i32
    scf.if %27 {
      %c0_15 = arith.constant 0 : index
      %c0_16 = arith.constant 0 : index
      %28 = vector.load %arg6[%c0_15, %c0_16] : memref<16x32xf32, #tpu.memory_space<vmem>>, vector<16x32xf32>
      %cst_17 = arith.constant 1.000000e-01 : f32
      %29 = vector.broadcast %cst_17 : f32 to vector<16x32xf32>
      %30 = arith.mulf %29, %28 : vector<16x32xf32>
      %31 = arith.addf %3, %30 : vector<16x32xf32>
      %c0_18 = arith.constant 0 : index
      %c0_19 = arith.constant 0 : index
      %32 = vector.load %arg6[%c0_18, %c0_19] : memref<16x32xf32, #tpu.memory_space<vmem>>, vector<16x32xf32>
      tpu.vector_store %arg6[%c0_18, %c0_19], %31 {strides = array<i32>} : memref<16x32xf32, #tpu.memory_space<vmem>>, vector<16x32xf32>,
    } else {
    }
    return
  }
  func.func @transform_0(%arg0: i32, %arg1: i32) -> (i32, i32) {
    %c0_i32 = arith.constant 0 : i32
    %c0_i32_0 = arith.constant 0 : i32
    return %arg0, %c0_i32 : i32, i32
  }
  func.func @transform_1(%arg0: i32, %arg1: i32) -> (i32, i32) {
    %c0_i32 = arith.constant 0 : i32
    %c0_i32_0 = arith.constant 0 : i32
    return %arg1, %c0_i32 : i32, i32
  }
  func.func @transform_2(%arg0: i32, %arg1: i32) -> (i32, i32) {
    %c0_i32 = arith.constant 0 : i32
    %c0_i32_0 = arith.constant 0 : i32
    return %c0_i32, %arg1 : i32, i32
  }
  func.func @transform_3(%arg0: i32, %arg1: i32) -> (i32, i32) {
    %c0_i32 = arith.constant 0 : i32
    %c0_i32_0 = arith.constant 0 : i32
    return %arg0, %c0_i32 : i32, i32
  }
  func.func @transform_4(%arg0: i32, %arg1: i32) -> (i32, i32) {
    %c0_i32 = arith.constant 0 : i32
    %c0_i32_0 = arith.constant 0 : i32
    return %arg0, %c0_i32 : i32, i32
  }
}

module attributes {stable_mosaic.version = 11 : i64} {
  func.func @_linear_predict_kernel(%arg0: i32, %arg1: i32, %arg2: memref<16x32xf32, #tpu.memory_space<vmem>>, %arg3: memref<64x32xbf16, #tpu.memory_space<vmem>>, %arg4: memref<1x64xf32, #tpu.memory_space<vmem>>, %arg5: memref<16x64xf32, #tpu.memory_space<vmem>>) attributes {dimension_semantics = [#tpu.dimension_semantics<parallel>, #tpu.dimension_semantics<parallel>], iteration_bounds = array<i64: 1, 1>, scalar_prefetch = 0 : i64, scratch_operands = 0 : i64, tpu.core_type = #tpu.core_type<tc>, window_params = [{transform_indices = @transform_0, window_bounds = array<i64: 16, 32>}, {transform_indices = @transform_1, window_bounds = array<i64: 64, 32>}, {transform_indices = @transform_2, window_bounds = array<i64: 1, 64>}, {transform_indices = @transform_3, window_bounds = array<i64: 16, 64>}]} {
    %c0 = arith.constant 0 : index
    %c0_0 = arith.constant 0 : index
    %0 = vector.load %arg2[%c0, %c0_0] : memref<16x32xf32, #tpu.memory_space<vmem>>, vector<16x32xf32>
    %1 = arith.truncf %0 : vector<16x32xf32> to vector<16x32xbf16>
    %c0_1 = arith.constant 0 : index
    %c0_2 = arith.constant 0 : index
    %2 = vector.load %arg3[%c0_1, %c0_2] : memref<64x32xbf16, #tpu.memory_space<vmem>>, vector<64x32xbf16>
    %cst = arith.constant dense<0.000000e+00> : vector<16x64xf32>
    %3 = tpu.matmul %1, %2, %cst {dimension_numbers = #tpu.dot_dimension_numbers<[1], [1], [0], [0], [0, 0, 1, 0], [], []>} : vector<16x32xbf16>, vector<64x32xbf16>, vector<16x64xf32> -> vector<16x64xf32>
    %c0_3 = arith.constant 0 : index
    %c0_4 = arith.constant 0 : index
    %4 = vector.load %arg4[%c0_3, %c0_4] : memref<1x64xf32, #tpu.memory_space<vmem>>, vector<1x64xf32>
    %5 = vector.broadcast %4 : vector<1x64xf32> to vector<16x64xf32>
    %6 = arith.addf %3, %5 : vector<16x64xf32>
    %c0_5 = arith.constant 0 : index
    %c0_6 = arith.constant 0 : index
    %7 = vector.load %arg5[%c0_5, %c0_6] : memref<16x64xf32, #tpu.memory_space<vmem>>, vector<16x64xf32>
    tpu.vector_store %arg5[%c0_5, %c0_6], %6 {strides = array<i32>} : memref<16x64xf32, #tpu.memory_space<vmem>>, vector<16x64xf32>,
    return
  }
  func.func @transform_0(%arg0: i32, %arg1: i32) -> (i32, i32) {
    %c0_i32 = arith.constant 0 : i32
    %c0_i32_0 = arith.constant 0 : i32
    return %arg0, %c0_i32 : i32, i32
  }
  func.func @transform_1(%arg0: i32, %arg1: i32) -> (i32, i32) {
    %c0_i32 = arith.constant 0 : i32
    %c0_i32_0 = arith.constant 0 : i32
    return %arg1, %c0_i32 : i32, i32
  }
  func.func @transform_2(%arg0: i32, %arg1: i32) -> (i32, i32) {
    %c0_i32 = arith.constant 0 : i32
    %c0_i32_0 = arith.constant 0 : i32
    return %c0_i32, %arg1 : i32, i32
  }
  func.func @transform_3(%arg0: i32, %arg1: i32) -> (i32, i32) {
    %c0_i32 = arith.constant 0 : i32
    return %arg0, %arg1 : i32, i32
  }
}

</mosaic_0001>

<bundles_post_ra>
// kernel: pc_transformer_forward.4
= control target key start
LH: loop header
LB: loop body
LE: loop exit
PB: predicated region body
PF: predicated region fallthrough
CT: control target
= control target key end

     0   :  { %vm22_vm0 = vcmask 261120   ;;  %v263_v0 = vmov 0.0   ;;  %vm264_vm1 = vmmov 0   ;;  %v265_v2 = vmov 0   ;;  %s359_s1 = inlined_call_operand.vmem [shape: bf16[64,32], index: 1, kind: input, shape index: {}]   ;;  %s360_s3 = inlined_call_operand.vmem [shape: s32[16,1], index: 3, kind: input, shape index: {}]   ;;  %s361_s0 = inlined_call_operand.vmem [shape: f32[16,32], index: 0, kind: input, shape index: {}]   ;;  %s362_s4 = inlined_call_operand.vmem [shape: f32[16,32], index: 4, kind: output, shape index: {}]   ;;  %s363_s2 = inlined_call_operand.vmem [shape: f32[1,64], index: 2, kind: input, shape index: {}]  }
   0x1   :  { %231 = vmatprep.subr.bf16.mxu0 %v263_v0  ;;  %v259_v1 = vld [vmem:[%s359_s1] sm:$0xff]   ;;  %239 = vmatprep.mubr.msk.bf16.mxu0 %vm264_vm1, %v263_v0  ;;  %v260_v4 = vld [vmem:[%s359_s1 + $0x8] sm:$0xff]   ;;  %v261_v8 = vld [vmem:[%s359_s1 + $0x10] sm:$0xff]   ;;  %23 = vst.msk [vmem:[%s362_s4] sm:$0xff] %vm22_vm0, %v263_v0  ;;  %v120_v16 = vlaneseq  ;;  %vm148_vm4 = vcmask 523264  }
   0x2   :  { %258 = vset.pattern.permute.xlu0 %v265_v2  ;;  %243 = vmatprep.subr.bf16.mxu1 %v263_v0  ;;  %v68_v3 = vsel %vm22_vm0, %v259_v1, 0  ;;  %v125_v5 = vld [vmem:[%s360_s3] sm:$0xff]  ;;  %v126_v6 = vld [vmem:[%s360_s3 + $0x8] sm:$0xff]  ;;  %v71_v7 = vsel %vm22_vm0, %v260_v4, 0  ;;  %v262_v9 = vld [vmem:[%s359_s1 + $0x18] sm:$0xff]   ;;  %v74_v10 = vsel %vm22_vm0, %v261_v8, 0 }
   0x3   :  { %244 = vmatpush3.bf16.msra.mxu1 %v259_v1  ;;  %251 = vmatprep.mubr.msk.bf16.mxu1 %vm264_vm1, %v263_v0  ;;  %v77_v11 = vsel %vm22_vm0, %v262_v9, 0  ;;  %v25_v12 = vld [vmem:[%s361_s0] sm:$0xff]  ;;  %v26_v13 = vld [vmem:[%s361_s0 + $0x8] sm:$0xff]  ;;  %24 = vst.msk [vmem:[%s362_s4 + $0x8] sm:$0xff] %vm22_vm0, %v263_v0  ;;  %v121_v17 = vand.u32 127, %v120_v16 }
   0x4   :  { %232 = vmatpush3.bf16.xpose.msra.mxu0 %v68_v3  ;;  %245 = vmatprep.subr.bf16.mxu1 %v263_v0  ;;  %v27_v14 = vpack.c.bf16 %v26_v13, %v25_v12  ;;  %v212_v19 = vld [vmem:[%s363_s2] ss:$0 sm:$0xff] }
   0x5   :  { %233 = vmatprep.subr.bf16.mxu0 %v263_v0  ;;  %128 = vperm.xlu0 %258, %v125_v5  }
   0x7   :  { %246 = vmatpush3.bf16.msra.mxu1 %v260_v4 }
   0x8   :  { %247 = vmatprep.subr.bf16.mxu1 %v263_v0  ;;  %v141_v31 = vld [vmem:[%s362_s4] sm:$0xff] }
   0x9   :  { %131 = vperm.xlu0 %258, %v126_v6  }
   0xa   :  { %v142_v33 = vld [vmem:[%s362_s4 + $0x8] sm:$0xff] }
   0xb   :  { %248 = vmatpush3.bf16.msra.mxu1 %v261_v8 }
   0xc   :  { %234 = vmatpush3.bf16.xpose.msra.mxu0 %v71_v7  ;;  %249 = vmatprep.subr.bf16.mxu1 %v263_v0 }
   0xd   :  { %235 = vmatprep.subr.bf16.mxu0 %v263_v0 }
   0xf   :  { %250 = vmatpush3.bf16.msra.mxu1 %v262_v9 }
  0x14   :  { %236 = vmatpush3.bf16.xpose.msra.mxu0 %v74_v10 }
  0x15   :  { %237 = vmatprep.subr.bf16.mxu0 %v263_v0 }
  0x1c   :  { %238 = vmatpush3.bf16.xpose.msra.mxu0 %v77_v11 }
  0x23   :  { %240 = vmatmul.mubr.msk.bf16.vlgmr.msra.gmra.mrb[0].mxu0 %vm22_vm0, %v27_v14 }
  0x84   :  { %v129_v15 = vpop.permute.xlu0 %128 }
  0x85   :  { %vm133_vm2 = vcmp.eq.s32.totalorder %v129_v15, %v121_v17 }
  0x86   :  { %v218_v26 = vsel %vm133_vm2, 1.0, %v263_v0 }
  0x88   :  { %v132_v18 = vpop.permute.xlu0 %131 }
  0x89   :  { %vm134_vm3 = vcmp.eq.s32.totalorder %v132_v18, %v121_v17 }
  0x8a   :  { %v219_v27 = vsel %vm134_vm3, 1.0, %v263_v0 }
  0xf6   :  { %v113_v20 = vpop.f32.mrb[0].mxu0 }
  0xf7   :  { %v114_v21 = vadd.f32 %v212_v19, %v113_v20  ;;  %v241_v22 = vpop.f32.mrb[1].mxu0 }
  0xf8   :  { %v116_v23 = vpop.f32.mrb[2].mxu0 }
  0xf9   :  { %v117_v24 = vadd.f32 %v212_v19, %v116_v23  ;;  %v242_v25 = vpop.f32.mrb[3].mxu0  ;;  %v139_v28 = vsub.f32 %v218_v26, %v114_v21 }
  0xfb   :  { %v140_v29 = vsub.f32 %v219_v27, %v117_v24 }
  0xfd   :  { %v143_v30 = vpack.c.bf16 %v140_v29, %v139_v28 }
  0xff   :  { %252 = vmatmul.mubr.msk.bf16.vlgmr.msra.gmra.mrb[0].mxu1 %vm148_vm4, %v143_v30 }
 0x1d2   :  { %v186_v32 = vpop.f32.mrb[0].mxu1 }
 0x1d3   :  { %v193_v34 = vadd.f32 %v186_v32, %v141_v31  ;;  %v253_v35 = vpop.f32.mrb[1].mxu1 }
 0x1d4   :  { %v189_v36 = vpop.f32.mrb[2].mxu1 }
 0x1d5   :  { %195 = vst.msk [vmem:[%s362_s4] sm:$0xff] %vm22_vm0, %v193_v34  ;;  %v194_v37 = vadd.f32 %v189_v36, %v142_v33  ;;  %v254_v38 = vpop.f32.mrb[3].mxu1 }
 0x1d7   :  { %196 = vst.msk [vmem:[%s362_s4 + $0x8] sm:$0xff] %vm22_vm0, %v194_v37 }
 0x1dc   :  { %v200_v39 = vld [vmem:[%s362_s4] sm:$0xff] }
 0x1dd   :  { %v202_v40 = vmul.f32 0.1, %v200_v39 }
 0x1de   :  { %v201_v41 = vld [vmem:[%s362_s4 + $0x8] sm:$0xff] }
 0x1df   :  { %v204_v42 = vadd.f32 %v202_v40, %v25_v12  ;;  %v203_v43 = vmul.f32 0.1, %v201_v41 }
 0x1e1   :  { %206 = vst.msk [vmem:[%s362_s4] sm:$0xff] %vm22_vm0, %v204_v42  ;;  %v205_v44 = vadd.f32 %v203_v43, %v26_v13 }
 0x1e3   :  { %207 = vst.msk [vmem:[%s362_s4 + $0x8] sm:$0xff] %vm22_vm0, %v205_v44 }

// kernel: pc_transformer_forward.7
= control target key start
LH: loop header
LB: loop body
LE: loop exit
PB: predicated region body
PF: predicated region fallthrough
CT: control target
= control target key end

     0   :  { %v186_v1 = vmov 0.0   ;;  %vm54_vm0 = vcmask 261120   ;;  %vm187_vm1 = vmmov 0   ;;  %s249_s0 = inlined_call_operand.vmem [shape: f32[16,32], index: 0, kind: input, shape index: {}]   ;;  %s250_s1 = inlined_call_operand.vmem [shape: bf16[64,32], index: 1, kind: input, shape index: {}]   ;;  %s251_s2 = inlined_call_operand.vmem [shape: f32[1,64], index: 2, kind: input, shape index: {}]   ;;  %s252_s3 = inlined_call_operand.hbm [shape: f32[16,64], index: 3, kind: output, shape index: {}]  }
   0x1   :  { %v158_v0 = vld [vmem:[%s250_s1] sm:$0xff]   ;;  %141 = vmatprep.subr.bf16.mxu0 %v186_v1  ;;  %v159_v3 = vld [vmem:[%s250_s1 + $0x8] sm:$0xff]   ;;  %149 = vmatprep.mubr.msk.bf16.mxu0 %vm187_vm1, %v186_v1 }
   0x2   :  { %v59_v2 = vsel %vm54_vm0, %v158_v0, 0 }
   0x3   :  { %142 = vmatpush3.bf16.xpose.msra.mxu0 %v59_v2 }
   0x4   :  { %143 = vmatprep.subr.bf16.mxu0 %v186_v1 }
   0x5   :  { %8 = vsyncpa [#allocation3], 0  ;;  %v62_v4 = vsel %vm54_vm0, %v159_v3, 0  ;;  %v160_v5 = vld [vmem:[%s250_s1 + $0x10] sm:$0xff]   ;;  %v161_v7 = vld [vmem:[%s250_s1 + $0x18] sm:$0xff]   ;;  %s188_s26 = smov [#allocation2]  }
   0x6   :  { %v65_v6 = vsel %vm54_vm0, %v160_v5, 0  ;;  %v68_v8 = vsel %vm54_vm0, %v161_v7, 0  ;;  %v16_v9 = vld [vmem:[%s249_s0] sm:$0xff]  ;;  %v17_v10 = vld [vmem:[%s249_s0 + $0x8] sm:$0xff]  ;;  %s119_s1 = sshll.u32 %s188_s26, 4  ;;  %vm111_vm2 = vcmask 523264   ;;  %s120_s1 = int_to_ptr.vmem [resolvable:$true] %s119_s1 }
   0x7   :  { %v18_v11 = vpack.c.bf16 %v17_v10, %v16_v9  ;;  %v130_v12 = vld [vmem:[%s251_s2] ss:$0 sm:$0xff]  ;;  %s162_s0 = scalar_lea.vmem %s120_s1, 256  ;;  %p167_p1 = scmp.lt.s32.totalorder %s120_s1, %s120_s1 }
   0x8   :  { %p163_p0 = scmp.ne.s32.totalorder %s120_s1, %s162_s0  ;;  %p168_p2 = scmp.lt.s32.totalorder %s162_s0, %s162_s0 }
   0xa   :  { %p169_p3 = por %p168_p2, %p167_p1 }
   0xb   :  { %144 = vmatpush3.bf16.xpose.msra.mxu0 %v62_v4 }
   0xc   :  { %145 = vmatprep.subr.bf16.mxu0 %v186_v1  ;;  %p170_p4 = pnand %p169_p3, %p163_p0 }
  0x13   :  { %146 = vmatpush3.bf16.xpose.msra.mxu0 %v65_v6 }
  0x14   :  { %147 = vmatprep.subr.bf16.mxu0 %v186_v1 }
  0x1b   :  { %148 = vmatpush3.bf16.xpose.msra.mxu0 %v68_v8 }
  0x22   :  { %150 = vmatmul.mubr.msk.bf16.vlgmr.msra.gmra.mrb[0].mxu0 %vm54_vm0, %v18_v11 }
  0xf5   :  { %v104_v13 = vpop.f32.mrb[0].mxu0 }
  0xf6   :  { %v105_v14 = vadd.f32 %v130_v12, %v104_v13  ;;  %v151_v15 = vpop.f32.mrb[1].mxu0 }
  0xf7   :  { %v107_v16 = vpop.f32.mrb[2].mxu0 }
  0xf8   :  { %112 = vst.msk [vmem:[#allocation2] sm:$0xff] %vm111_vm2, %v105_v14  ;;  %v108_v17 = vadd.f32 %v130_v12, %v107_v16  ;;  %v152_v18 = vpop.f32.mrb[3].mxu0 }
  0xfa   :  { %113 = vst.msk [vmem:[#allocation2 + $0x8] sm:$0xff] %vm111_vm2, %v108_v17 }
  0xfb   :  { %173 = shalt.err (!%p170_p4)
}
  0xfc   :  { %s174_s28 = scalar_lea.hbm %s252_s3, 256 }
  0xfd   :  { %p175_p5 = scmp.ne.s32.totalorder %s252_s3, %s174_s28  ;;  %p178_p6 = scmp.lt.u32.totalorder %s174_s28, %s252_s3 }
  0xff   :  { %p180_p7 = pnand %p178_p6, %p175_p5 }
 0x101   :  { %183 = shalt.err (!%p180_p7)
}
 0x102   :  { %s189_s6 = smov 128   ;;  %s190_s7 = smov 8  }
 0x103   :  { %125 = dma.vmem_to_hbm [thread:$0]  %s120_s1, 256, %s252_s3, [#allocation3], %s189_s6, %s189_s6, %s190_s7  }
 0x104   :  { %184 = dma.done.wait [#allocation3], 256  }
 0x105   :  { %185 = vsyncadd [#allocation3], 4294967040 }
 0x106   :  { %129 = vsyncpa [#allocation3], 1 }

</bundles_post_ra>
